<compile_context>
chip_gen: v7x
topology: tpu7x:2x2x1
jax: 0.10.0
libtpu: 0.0.40
codegen_flags: <defaults>
</compile_context>

<pallas_src>
import jax
import jax.numpy as jnp
from jax.experimental import pallas as pl
from jax.experimental.pallas import tpu as pltpu


def critic_kernel(x_ref, w1_ref, b1_ref, w2_ref, b2_ref, w3t_ref, b3_ref, o_ref):
    # h1 = relu(x @ W1 + b1)   (MXU, f32 accumulation)
    h1 = jnp.dot(x_ref[...], w1_ref[...], preferred_element_type=jnp.float32)
    h1 = jnp.maximum(h1 + b1_ref[...], 0.0)
    # Match W2 dtype so a bf16 W2 keeps the second matmul on the fast MXU path.
    h1 = h1.astype(w2_ref.dtype)
    # h2 = relu(h1 @ W2 + b2)
    h2 = jnp.dot(h1, w2_ref[...], preferred_element_type=jnp.float32)
    h2 = jnp.maximum(h2 + b2_ref[...], 0.0)
    # v = h2 @ W3 + b3, computed as a VPU multiply + lane reduction against the
    # lane-dense (1, fc2) transposed weight instead of an N=1 MXU matmul.
    v = jnp.sum(h2 * w3t_ref[...], axis=-1, keepdims=True)
    # Output is [tm, 1] (last-dim-1 store). Negligible at these sizes; for very
    # large B a lane-dense [1, tm] output slab would speed up the store path.
    o_ref[...] = v + b3_ref[...]


def _round_up(x, m):
    return (x + m - 1) // m * m


def critic_forward(state, params, *, tm=256, use_bf16=False):
    """state: [B, D] float32. params: dict of W1,b1,W2,b2,W3,b3 (f32).

    Returns [B, 1] float32 value estimates.
    """
    B, D = state.shape
    fc1 = params["W1"].shape[1]
    fc2 = params["W2"].shape[1]

    # Batch tiling: pad B to a sublane multiple (8) and tile by tm rows.
    if B <= tm:
        B_pad = _round_up(B, 8)
        tm_eff = B_pad
    else:
        B_pad = _round_up(B, tm)
        tm_eff = tm
    grid = (B_pad // tm_eff,)

    x = state
    if B_pad != B:
        x = jnp.pad(x, ((0, B_pad - B), (0, 0)))

    w1, w2 = params["W1"], params["W2"]
    if use_bf16:
        # Worthwhile only when MXU-bound (large B) on v6e/v7x; keep f32 on v5e.
        x = x.astype(jnp.bfloat16)
        w1 = w1.astype(jnp.bfloat16)
        w2 = w2.astype(jnp.bfloat16)

    # Lane-dense transposed final weight: (fc2, 1) -> (1, fc2).
    w3t = params["W3"].T

    flops = 2 * B_pad * (D * fc1 + fc1 * fc2 + fc2)
    bytes_accessed = int(
        x.size * x.dtype.itemsize
        + w1.size * w1.dtype.itemsize
        + w2.size * w2.dtype.itemsize
        + 4 * (fc1 + fc2 + fc2 + 1 + B_pad)  # b1, b2, W3^T, b3, output
    )

    def resident(shape):
        # Constant index_map: block stays resident across batch grid steps.
        return pl.BlockSpec(shape, lambda i, _n=len(shape): (0,) * _n)

    out = pl.pallas_call(
        critic_kernel,
        out_shape=jax.ShapeDtypeStruct((B_pad, 1), jnp.float32),
        grid=grid,
        in_specs=[
            pl.BlockSpec((tm_eff, D), lambda i: (i, 0)),  # x: streamed over batch
            resident((D, fc1)),    # W1
            resident((1, fc1)),    # b1
            resident((fc1, fc2)),  # W2
            resident((1, fc2)),    # b2
            resident((1, fc2)),    # W3^T (lane-dense row)
            resident((1, 1)),      # b3
        ],
        out_specs=pl.BlockSpec((tm_eff, 1), lambda i: (i, 0)),
        compiler_params=pltpu.CompilerParams(
            dimension_semantics=("parallel",),
        ),
        cost_estimate=pl.CostEstimate(
            flops=flops, transcendentals=0, bytes_accessed=bytes_accessed
        ),
    )(x, w1, params["b1"], w2, params["b2"], w3t, params["b3"])

    return out[:B]


def init_params(key, input_dims, fc1_dims=256, fc2_dims=256):
    """Deterministic synthetic init (Kaiming-uniform-ish), shapes match nn.Linear."""
    k1, k2, k3, k4, k5, k6 = jax.random.split(key, 6)

    def lin(kw, kb, fan_in, fan_out):
        bound = 1.0 / jnp.sqrt(fan_in)
        W = jax.random.uniform(kw, (fan_in, fan_out), jnp.float32, -bound, bound)
        b = jax.random.uniform(kb, (1, fan_out), jnp.float32, -bound, bound)
        return W, b

    W1, b1 = lin(k1, k2, input_dims, fc1_dims)
    W2, b2 = lin(k3, k4, fc1_dims, fc2_dims)
    W3, b3 = lin(k5, k6, fc2_dims, 1)
    return {"W1": W1, "b1": b1, "W2": W2, "b2": b2, "W3": W3, "b3": b3}


def reference_forward(state, p):
    h1 = jnp.maximum(state @ p["W1"] + p["b1"], 0.0)
    h2 = jnp.maximum(h1 @ p["W2"] + p["b2"], 0.0)
    return h2 @ p["W3"] + p["b3"]


if __name__ == "__main__":
    key = jax.random.PRNGKey(0)
    k_state, k_params, k_state2 = jax.random.split(key, 3)

    batch = 8
    input_dims = 32
    state = jax.random.normal(k_state, (batch, input_dims), dtype=jnp.float32)
    params = init_params(k_params, input_dims, fc1_dims=256, fc2_dims=256)

    # Small-batch path (single grid step, padded to 8 sublanes).
    out = critic_forward(state, params)
    out = jax.block_until_ready(out)
    ref = reference_forward(state, params)
    assert out.shape == (batch, 1)
    assert jnp.allclose(out, ref, atol=1e-4, rtol=1e-4)

    # Multi-step batch grid path (padding + resident weights across steps).
    state2 = jax.random.normal(k_state2, (40, input_dims), dtype=jnp.float32)
    out2 = jax.block_until_ready(critic_forward(state2, params, tm=16))
    ref2 = reference_forward(state2, params)
    assert out2.shape == (40, 1)
    assert jnp.allclose(out2, ref2, atol=1e-4, rtol=1e-4)

    print("KERNEL_OK")
</pallas_src>

<mosaic_0001>
module attributes {stable_mosaic.version = 11 : i64} {
  func.func @critic_kernel(%arg0: i32, %arg1: memref<8x32xf32, #tpu.memory_space<vmem>>, %arg2: memref<32x256xf32, #tpu.memory_space<vmem>>, %arg3: memref<1x256xf32, #tpu.memory_space<vmem>>, %arg4: memref<256x256xf32, #tpu.memory_space<vmem>>, %arg5: memref<1x256xf32, #tpu.memory_space<vmem>>, %arg6: memref<1x256xf32, #tpu.memory_space<vmem>>, %arg7: memref<1x1xf32, #tpu.memory_space<vmem>>, %arg8: memref<8x1xf32, #tpu.memory_space<vmem>>) attributes {dimension_semantics = [#tpu.dimension_semantics<parallel>], iteration_bounds = array<i64: 1>, scalar_prefetch = 0 : i64, scratch_operands = 0 : i64, tpu.core_type = #tpu.core_type<tc>, window_params = [{transform_indices = @transform_0, window_bounds = array<i64: 8, 32>}, {pipeline_mode = #tpu.pipeline_mode<synchronous>, transform_indices = @transform_1, window_bounds = array<i64: 32, 256>}, {pipeline_mode = #tpu.pipeline_mode<synchronous>, transform_indices = @transform_2, window_bounds = array<i64: 1, 256>}, {pipeline_mode = #tpu.pipeline_mode<synchronous>, transform_indices = @transform_3, window_bounds = array<i64: 256, 256>}, {pipeline_mode = #tpu.pipeline_mode<synchronous>, transform_indices = @transform_4, window_bounds = array<i64: 1, 256>}, {pipeline_mode = #tpu.pipeline_mode<synchronous>, transform_indices = @transform_5, window_bounds = array<i64: 1, 256>}, {pipeline_mode = #tpu.pipeline_mode<synchronous>, transform_indices = @transform_6, window_bounds = array<i64: 1, 1>}, {transform_indices = @transform_7, window_bounds = array<i64: 8, 1>}]} {
    %c0 = arith.constant 0 : index
    %c0_0 = arith.constant 0 : index
    %0 = vector.load %arg1[%c0, %c0_0] : memref<8x32xf32, #tpu.memory_space<vmem>>, vector<8x32xf32>
    %c0_1 = arith.constant 0 : index
    %c0_2 = arith.constant 0 : index
    %1 = vector.load %arg2[%c0_1, %c0_2] : memref<32x256xf32, #tpu.memory_space<vmem>>, vector<32x256xf32>
    %cst = arith.constant dense<0.000000e+00> : vector<8x256xf32>
    %2 = tpu.matmul %0, %1, %cst {dimension_numbers = #tpu.dot_dimension_numbers<[1], [0], [0], [1], [0, 0, 1, 1], [], []>} : vector<8x32xf32>, vector<32x256xf32>, vector<8x256xf32> -> vector<8x256xf32>
    %c0_3 = arith.constant 0 : index
    %c0_4 = arith.constant 0 : index
    %3 = vector.load %arg3[%c0_3, %c0_4] : memref<1x256xf32, #tpu.memory_space<vmem>>, vector<1x256xf32>
    %4 = vector.broadcast %3 : vector<1x256xf32> to vector<8x256xf32>
    %5 = arith.addf %2, %4 : vector<8x256xf32>
    %cst_5 = arith.constant 0.000000e+00 : f32
    %6 = vector.broadcast %cst_5 : f32 to vector<8x256xf32>
    %7 = arith.maximumf %5, %6 : vector<8x256xf32>
    %c0_6 = arith.constant 0 : index
    %c0_7 = arith.constant 0 : index
    %8 = vector.load %arg4[%c0_6, %c0_7] : memref<256x256xf32, #tpu.memory_space<vmem>>, vector<256x256xf32>
    %cst_8 = arith.constant dense<0.000000e+00> : vector<8x256xf32>
    %9 = tpu.matmul %7, %8, %cst_8 {dimension_numbers = #tpu.dot_dimension_numbers<[1], [0], [0], [1], [0, 0, 1, 1], [], []>} : vector<8x256xf32>, vector<256x256xf32>, vector<8x256xf32> -> vector<8x256xf32>
    %c0_9 = arith.constant 0 : index
    %c0_10 = arith.constant 0 : index
    %10 = vector.load %arg5[%c0_9, %c0_10] : memref<1x256xf32, #tpu.memory_space<vmem>>, vector<1x256xf32>
    %11 = vector.broadcast %10 : vector<1x256xf32> to vector<8x256xf32>
    %12 = arith.addf %9, %11 : vector<8x256xf32>
    %cst_11 = arith.constant 0.000000e+00 : f32
    %13 = vector.broadcast %cst_11 : f32 to vector<8x256xf32>
    %14 = arith.maximumf %12, %13 : vector<8x256xf32>
    %c0_12 = arith.constant 0 : index
    %c0_13 = arith.constant 0 : index
    %15 = vector.load %arg6[%c0_12, %c0_13] : memref<1x256xf32, #tpu.memory_space<vmem>>, vector<1x256xf32>
    %16 = vector.broadcast %15 : vector<1x256xf32> to vector<8x256xf32>
    %17 = arith.mulf %14, %16 : vector<8x256xf32>
    %cst_14 = arith.constant dense<0.000000e+00> : vector<8xf32>
    %18 = vector.multi_reduction <add>, %17, %cst_14 [1] : vector<8x256xf32> to vector<8xf32>
    %19 = vector.shape_cast %18 : vector<8xf32> to vector<8x1xf32>
    %c0_15 = arith.constant 0 : index
    %c0_16 = arith.constant 0 : index
    %20 = vector.load %arg7[%c0_15, %c0_16] : memref<1x1xf32, #tpu.memory_space<vmem>>, vector<1x1xf32>
    %21 = vector.broadcast %20 : vector<1x1xf32> to vector<8x1xf32>
    %22 = arith.addf %19, %21 : vector<8x1xf32>
    %c0_17 = arith.constant 0 : index
    %c0_18 = arith.constant 0 : index
    %23 = vector.load %arg8[%c0_17, %c0_18] : memref<8x1xf32, #tpu.memory_space<vmem>>, vector<8x1xf32>
    tpu.vector_store %arg8[%c0_17, %c0_18], %22 {strides = array<i32>} : memref<8x1xf32, #tpu.memory_space<vmem>>, vector<8x1xf32>,
    return
  }
  func.func @transform_0(%arg0: i32) -> (i32, i32) {
    %c0_i32 = arith.constant 0 : i32
    %c0_i32_0 = arith.constant 0 : i32
    return %arg0, %c0_i32 : i32, i32
  }
  func.func @transform_1(%arg0: i32) -> (i32, i32) {
    %c0_i32 = arith.constant 0 : i32
    %c0_i32_0 = arith.constant 0 : i32
    %c0_i32_1 = arith.constant 0 : i32
    return %c0_i32, %c0_i32_0 : i32, i32
  }
  func.func @transform_2(%arg0: i32) -> (i32, i32) {
    %c0_i32 = arith.constant 0 : i32
    %c0_i32_0 = arith.constant 0 : i32
    %c0_i32_1 = arith.constant 0 : i32
    return %c0_i32, %c0_i32_0 : i32, i32
  }
  func.func @transform_3(%arg0: i32) -> (i32, i32) {
    %c0_i32 = arith.constant 0 : i32
    %c0_i32_0 = arith.constant 0 : i32
    %c0_i32_1 = arith.constant 0 : i32
    return %c0_i32, %c0_i32_0 : i32, i32
  }
  func.func @transform_4(%arg0: i32) -> (i32, i32) {
    %c0_i32 = arith.constant 0 : i32
    %c0_i32_0 = arith.constant 0 : i32
    %c0_i32_1 = arith.constant 0 : i32
    return %c0_i32, %c0_i32_0 : i32, i32
  }
  func.func @transform_5(%arg0: i32) -> (i32, i32) {
    %c0_i32 = arith.constant 0 : i32
    %c0_i32_0 = arith.constant 0 : i32
    %c0_i32_1 = arith.constant 0 : i32
    return %c0_i32, %c0_i32_0 : i32, i32
  }
  func.func @transform_6(%arg0: i32) -> (i32, i32) {
    %c0_i32 = arith.constant 0 : i32
    %c0_i32_0 = arith.constant 0 : i32
    %c0_i32_1 = arith.constant 0 : i32
    return %c0_i32, %c0_i32_0 : i32, i32
  }
  func.func @transform_7(%arg0: i32) -> (i32, i32) {
    %c0_i32 = arith.constant 0 : i32
    %c0_i32_0 = arith.constant 0 : i32
    return %arg0, %c0_i32 : i32, i32
  }
}

</mosaic_0001>

<bundles_post_ra>
// kernel: tpu_custom_call.1
= control target key start
LH: loop header
LB: loop body
LE: loop exit
PB: predicated region body
PF: predicated region fallthrough
CT: control target
= control target key end

     0   :  { %s600_s0 = inlined_call_operand.hbm [shape: f32[8,32], index: 0, kind: input, shape index: {}]   ;;  %s601_s1 = inlined_call_operand.hbm [shape: f32[32,256], index: 1, kind: input, shape index: {}]   ;;  %s602_s2 = inlined_call_operand.vmem [shape: f32[1,256], index: 2, kind: input, shape index: {}]   ;;  %s603_s3 = inlined_call_operand.hbm [shape: f32[256,256], index: 3, kind: input, shape index: {}]   ;;  %s604_s4 = inlined_call_operand.vmem [shape: f32[1,256], index: 4, kind: input, shape index: {}]   ;;  %s605_s5 = inlined_call_operand.vmem [shape: f32[1,256], index: 5, kind: input, shape index: {}]   ;;  %s606_s6 = inlined_call_operand.<no memory space> [shape: f32[1,1], index: 6, kind: input, shape index: {}]   ;;  %s607_s7 = inlined_call_operand.vmem [shape: f32[8,1], index: 7, kind: output, shape index: {}]  }
   0x1   :  { %v12_v0 = vstv %s606_s6 }
   0x2   :  { %13 = vst [vmem:[#allocation2] sm:$0x1] %v12_v0 }
   0x3   :  { %14 = vsyncpa [#allocation4], 0 }
   0x4   :  { %15 = vsyncpa [#allocation6], 0  ;;  %s497_s26 = smov [#allocation5]   ;;  %s427_s30 = scalar_lea.hbm %s601_s1, 1024 }
   0x5   :  { %s31_s27 = sshll.u32 %s497_s26, 4  ;;  %p428_p0 = scmp.ne.s32.totalorder %s601_s1, %s427_s30  ;;  %s32_s27 = int_to_ptr.vmem [resolvable:$true] %s31_s27 }
   0x6   :  { %p431_p1 = scmp.lt.u32.totalorder %s427_s30, %s601_s1 }
   0x8   :  { %p433_p2 = pnand %p431_p1, %p428_p0 }
   0xa   :  { %436 = shalt.err (!%p433_p2)
}
   0xb   :  { %s437_s6 = scalar_lea.vmem %s32_s27, 1024  ;;  %p442_p4 = scmp.lt.s32.totalorder %s32_s27, %s32_s27 }
   0xc   :  { %p438_p3 = scmp.ne.s32.totalorder %s32_s27, %s437_s6  ;;  %p443_p5 = scmp.lt.s32.totalorder %s437_s6, %s437_s6 }
   0xe   :  { %p444_p6 = por %p443_p5, %p442_p4 }
  0x10   :  { %p445_p7 = pnand %p444_p6, %p438_p3 }
  0x12   :  { %448 = shalt.err (!%p445_p7)
}
  0x13   :  { %s498_s12 = smov 256   ;;  %s499_s13 = smov 16  }
  0x14   :  { %37 = dma.hbm_to_vmem [thread:$0]  %s601_s1, 1024, %s32_s27, [#allocation6], %s498_s12, %s498_s12, %s499_s13  }
  0x15   :  { %s500_s16 = smov [#allocation3]   ;;  %s501_s18 = smov [#allocation7]  }
  0x16   :  { %s22_s17 = sshll.u32 %s500_s16, 4  ;;  %s45_s19 = sshll.u32 %s501_s18, 4  ;;  %s23_s17 = int_to_ptr.vmem [resolvable:$true] %s22_s17  ;;  %s46_s19 = int_to_ptr.vmem [resolvable:$true] %s45_s19 }
  0x17   :  { %s449_s22 = scalar_lea.hbm %s600_s0, 128 }
  0x18   :  { %p450_p8 = scmp.ne.s32.totalorder %s600_s0, %s449_s22  ;;  %p453_p9 = scmp.lt.u32.totalorder %s449_s22, %s600_s0 }
  0x1a   :  { %p455_p10 = pnand %p453_p9, %p450_p8 }
  0x1c   :  { %458 = shalt.err (!%p455_p10)
}
  0x1d   :  { %s459_s1 = scalar_lea.vmem %s23_s17, 128  ;;  %p464_p12 = scmp.lt.s32.totalorder %s23_s17, %s23_s17 }
  0x1e   :  { %p460_p11 = scmp.ne.s32.totalorder %s23_s17, %s459_s1  ;;  %p465_p13 = scmp.lt.s32.totalorder %s459_s1, %s459_s1 }
  0x20   :  { %p466_p0 = por %p465_p13, %p464_p12 }
  0x22   :  { %p467_p1 = pnand %p466_p0, %p460_p11 }
  0x24   :  { %470 = shalt.err (!%p467_p1)
}
  0x25   :  { %25 = dma.hbm_to_vmem [thread:$0]  %s600_s0, 128, %s23_s17, [#allocation4]  }
  0x26   :  { %s471_s8 = scalar_lea.hbm %s603_s3, 8192 }
  0x27   :  { %p472_p2 = scmp.ne.s32.totalorder %s603_s3, %s471_s8  ;;  %p475_p3 = scmp.lt.u32.totalorder %s471_s8, %s603_s3 }
  0x29   :  { %p477_p4 = pnand %p475_p3, %p472_p2 }
  0x2b   :  { %480 = shalt.err (!%p477_p4)
}
  0x2c   :  { %s481_s14 = scalar_lea.vmem %s46_s19, 8192  ;;  %p486_p6 = scmp.lt.s32.totalorder %s46_s19, %s46_s19 }
  0x2d   :  { %p482_p5 = scmp.ne.s32.totalorder %s46_s19, %s481_s14  ;;  %p487_p7 = scmp.lt.s32.totalorder %s481_s14, %s481_s14 }
  0x2f   :  { %p488_p8 = por %p487_p7, %p486_p6 }
  0x31   :  { %p489_p9 = pnand %p488_p8, %p482_p5 }
  0x33   :  { %492 = shalt.err (!%p489_p9)
}
  0x34   :  { %51 = dma.hbm_to_vmem [thread:$0]  %s603_s3, 8192, %s46_s19, [#allocation6], %s498_s12, %s498_s12, %s499_s13  }
  0x35   :  { %493 = dma.done.wait [#allocation4], 128  }
  0x36   :  { %494 = vsyncadd [#allocation4], 4294967168 }
  0x37   :  { %495 = dma.done.wait [#allocation6], 9216  }
  0x38   :  { %496 = vsyncadd [#allocation6], 4294958080  ;;  %v502_v1 = vmov 0.0   ;;  %v69_v2 = vld [vmem:[#allocation5 + $0x8] sm:$0xff]  ;;  %v71_v3 = vld [vmem:[#allocation5 + $0x18] sm:$0xff]  ;;  %vm88_vm0 = vcmask 261120  }
  0x39   :  { %156 = vmatprep.mubr.f32.mxu0 %v502_v1  ;;  %v68_v4 = vld [vmem:[#allocation5] sm:$0xff]  ;;  %v349_v5 = vpack.c.bf16 %v71_v3, %v69_v2  ;;  %v70_v6 = vld [vmem:[#allocation5 + $0x10] sm:$0xff]  ;;  %v73_v7 = vld [vmem:[#allocation5 + $0x28] sm:$0xff]  ;;  %vm339_vm1 = vcmask 7168  }
  0x3a   :  { %v75_v8 = vld [vmem:[#allocation5 + $0x38] sm:$0xff]  ;;  %v351_v9 = vpack.c.bf16 %v70_v6, %v68_v4  ;;  %v72_v11 = vld [vmem:[#allocation5 + $0x20] sm:$0xff]  ;;  %v74_v12 = vld [vmem:[#allocation5 + $0x30] sm:$0xff] }
  0x3b   :  { %v353_v10 = vpack.c.bf16 %v75_v8, %v73_v7  ;;  %350 = vmatprep.subr.bf16.mxu0 %v349_v5  ;;  %v166_v13 = vld [vmem:[#allocation7 + $0x8] sm:$0xff]  ;;  %v168_v14 = vld [vmem:[#allocation7 + $0x18] sm:$0xff]  ;;  %v165_v15 = vld [vmem:[#allocation7] sm:$0xff]  ;;  %v355_v16 = vpack.c.bf16 %v74_v12, %v72_v11 }
  0x3c   :  { %352 = vmatpush1.bf16.msra.mxu0 %v351_v9  ;;  %v357_v17 = vpack.c.bf16 %v168_v14, %v166_v13  ;;  %v167_v18 = vld [vmem:[#allocation7 + $0x10] sm:$0xff]  ;;  %v170_v19 = vld [vmem:[#allocation7 + $0x28] sm:$0xff]  ;;  %v172_v20 = vld [vmem:[#allocation7 + $0x38] sm:$0xff] }
  0x3d   :  { %354 = vmatprep.subr.bf16.mxu0 %v353_v10  ;;  %v359_v21 = vpack.c.bf16 %v167_v18, %v165_v15  ;;  %v361_v22 = vpack.c.bf16 %v172_v20, %v170_v19  ;;  %v169_v23 = vld [vmem:[#allocation7 + $0x20] sm:$0xff]  ;;  %v171_v24 = vld [vmem:[#allocation7 + $0x30] sm:$0xff]  ;;  %v174_v25 = vld [vmem:[#allocation7 + $0x48] sm:$0xff] }
  0x3e   :  { %358 = vmatprep.subr.bf16.mxu1 %v357_v17  ;;  %v176_v26 = vld [vmem:[#allocation7 + $0x58] sm:$0xff]  ;;  %v363_v27 = vpack.c.bf16 %v171_v24, %v169_v23  ;;  %v173_v30 = vld [vmem:[#allocation7 + $0x40] sm:$0xff]  ;;  %v175_v31 = vld [vmem:[#allocation7 + $0x50] sm:$0xff] }
  0x3f   :  { %360 = vmatpush1.bf16.msra.mxu1 %v359_v21  ;;  %v67_v28 = vld [vmem:[#allocation3] sm:$0xff]  ;;  %v365_v29 = vpack.c.bf16 %v176_v26, %v174_v25  ;;  %v178_v32 = vld [vmem:[#allocation7 + $0x68] sm:$0xff]  ;;  %v367_v34 = vpack.c.bf16 %v175_v31, %v173_v30  ;;  %v177_v36 = vld [vmem:[#allocation7 + $0x60] sm:$0xff] }
  0x40   :  { %356 = vmatpush1.bf16.msra.mxu0 %v355_v16  ;;  %362 = vmatprep.subr.bf16.mxu1 %v361_v22  ;;  %v180_v33 = vld [vmem:[#allocation7 + $0x78] sm:$0xff]  ;;  %v179_v37 = vld [vmem:[#allocation7 + $0x70] sm:$0xff]  ;;  %v182_v38 = vld [vmem:[#allocation7 + $0x88] sm:$0xff] }
  0x41   :  { %v369_v35 = vpack.c.bf16 %v180_v33, %v178_v32  ;;  %v184_v39 = vld [vmem:[#allocation7 + $0x98] sm:$0xff]  ;;  %v371_v40 = vpack.c.bf16 %v179_v37, %v177_v36  ;;  %v181_v42 = vld [vmem:[#allocation7 + $0x80] sm:$0xff]  ;;  %v183_v43 = vld [vmem:[#allocation7 + $0x90] sm:$0xff] }
  0x42   :  { %v373_v41 = vpack.c.bf16 %v184_v39, %v182_v38  ;;  %v186_v44 = vld [vmem:[#allocation7 + $0xa8] sm:$0xff]  ;;  %v188_v45 = vld [vmem:[#allocation7 + $0xb8] sm:$0xff]  ;;  %v375_v46 = vpack.c.bf16 %v183_v43, %v181_v42  ;;  %v185_v48 = vld [vmem:[#allocation7 + $0xa0] sm:$0xff] }
  0x43   :  { %347 = vmatmul.mubr.msk.f32.vlgmr.msra.gmra.mrb[0].mxu0 %vm88_vm0, %v67_v28  ;;  %364 = vmatpush1.bf16.msra.mxu1 %v363_v27  ;;  %v377_v47 = vpack.c.bf16 %v188_v45, %v186_v44  ;;  %v187_v49 = vld [vmem:[#allocation7 + $0xb0] sm:$0xff]  ;;  %v190_v50 = vld [vmem:[#allocation7 + $0xc8] sm:$0xff]  ;;  %v192_v51 = vld [vmem:[#allocation7 + $0xd8] sm:$0xff] }
  0x44   :  { %366 = vmatprep.subr.bf16.mxu1 %v365_v29  ;;  %v379_v52 = vpack.c.bf16 %v187_v49, %v185_v48  ;;  %v381_v53 = vpack.c.bf16 %v192_v51, %v190_v50  ;;  %v189_v54 = vld [vmem:[#allocation7 + $0xc0] sm:$0xff]  ;;  %v191_v55 = vld [vmem:[#allocation7 + $0xd0] sm:$0xff]  ;;  %v194_v56 = vld [vmem:[#allocation7 + $0xe8] sm:$0xff] }
  0x45   :  { %v196_v57 = vld [vmem:[#allocation7 + $0xf8] sm:$0xff]  ;;  %v383_v58 = vpack.c.bf16 %v191_v55, %v189_v54  ;;  %v193_v60 = vld [vmem:[#allocation7 + $0xe0] sm:$0xff]  ;;  %v195_v61 = vld [vmem:[#allocation7 + $0xf0] sm:$0xff] }
  0x46   :  { %v385_v59 = vpack.c.bf16 %v196_v57, %v194_v56  ;;  %v198_v62 = vld [vmem:[#allocation7 + $0x108] sm:$0xff]  ;;  %v200_v63 = vld [vmem:[#allocation7 + $0x118] sm:$0xff]  ;;  %v387_v0 = vpack.c.bf16 %v195_v61, %v193_v60  ;;  %v197_v2 = vld [vmem:[#allocation7 + $0x100] sm:$0xff] }
  0x47   :  { %368 = vmatpush1.bf16.msra.mxu1 %v367_v34  ;;  %v389_v1 = vpack.c.bf16 %v200_v63, %v198_v62  ;;  %v199_v3 = vld [vmem:[#allocation7 + $0x110] sm:$0xff]  ;;  %v202_v4 = vld [vmem:[#allocation7 + $0x128] sm:$0xff]  ;;  %v204_v5 = vld [vmem:[#allocation7 + $0x138] sm:$0xff] }
  0x48   :  { %370 = vmatprep.subr.bf16.mxu1 %v369_v35  ;;  %v391_v6 = vpack.c.bf16 %v199_v3, %v197_v2  ;;  %v393_v7 = vpack.c.bf16 %v204_v5, %v202_v4  ;;  %v201_v8 = vld [vmem:[#allocation7 + $0x120] sm:$0xff]  ;;  %v203_v9 = vld [vmem:[#allocation7 + $0x130] sm:$0xff]  ;;  %v206_v10 = vld [vmem:[#allocation7 + $0x148] sm:$0xff] }
  0x49   :  { %v208_v11 = vld [vmem:[#allocation7 + $0x158] sm:$0xff]  ;;  %v395_v12 = vpack.c.bf16 %v203_v9, %v201_v8  ;;  %v205_v14 = vld [vmem:[#allocation7 + $0x140] sm:$0xff]  ;;  %v207_v15 = vld [vmem:[#allocation7 + $0x150] sm:$0xff] }
  0x4a   :  { %v397_v13 = vpack.c.bf16 %v208_v11, %v206_v10  ;;  %v210_v16 = vld [vmem:[#allocation7 + $0x168] sm:$0xff]  ;;  %v212_v17 = vld [vmem:[#allocation7 + $0x178] sm:$0xff]  ;;  %v399_v18 = vpack.c.bf16 %v207_v15, %v205_v14  ;;  %v209_v20 = vld [vmem:[#allocation7 + $0x160] sm:$0xff] }
  0x4b   :  { %372 = vmatpush1.bf16.msra.mxu1 %v371_v40  ;;  %v401_v19 = vpack.c.bf16 %v212_v17, %v210_v16  ;;  %v211_v21 = vld [vmem:[#allocation7 + $0x170] sm:$0xff]  ;;  %v214_v22 = vld [vmem:[#allocation7 + $0x188] sm:$0xff]  ;;  %v216_v23 = vld [vmem:[#allocation7 + $0x198] sm:$0xff] }
  0x4c   :  { %374 = vmatprep.subr.bf16.mxu1 %v373_v41  ;;  %v403_v24 = vpack.c.bf16 %v211_v21, %v209_v20  ;;  %v405_v25 = vpack.c.bf16 %v216_v23, %v214_v22  ;;  %v213_v26 = vld [vmem:[#allocation7 + $0x180] sm:$0xff]  ;;  %v215_v27 = vld [vmem:[#allocation7 + $0x190] sm:$0xff]  ;;  %v218_v28 = vld [vmem:[#allocation7 + $0x1a8] sm:$0xff] }
  0x4d   :  { %v220_v29 = vld [vmem:[#allocation7 + $0x1b8] sm:$0xff]  ;;  %v407_v30 = vpack.c.bf16 %v215_v27, %v213_v26  ;;  %v217_v32 = vld [vmem:[#allocation7 + $0x1a0] sm:$0xff]  ;;  %v219_v33 = vld [vmem:[#allocation7 + $0x1b0] sm:$0xff] }
  0x4e   :  { %v409_v31 = vpack.c.bf16 %v220_v29, %v218_v28  ;;  %v222_v34 = vld [vmem:[#allocation7 + $0x1c8] sm:$0xff]  ;;  %v224_v35 = vld [vmem:[#allocation7 + $0x1d8] sm:$0xff]  ;;  %v411_v36 = vpack.c.bf16 %v219_v33, %v217_v32  ;;  %v221_v38 = vld [vmem:[#allocation7 + $0x1c0] sm:$0xff] }
  0x4f   :  { %376 = vmatpush1.bf16.msra.mxu1 %v375_v46  ;;  %v413_v37 = vpack.c.bf16 %v224_v35, %v222_v34  ;;  %v223_v39 = vld [vmem:[#allocation7 + $0x1d0] sm:$0xff]  ;;  %v226_v41 = vld [vmem:[#allocation7 + $0x1e8] sm:$0xff]  ;;  %v228_v42 = vld [vmem:[#allocation7 + $0x1f8] sm:$0xff] }
  0x50   :  { %378 = vmatprep.subr.bf16.mxu1 %v377_v47  ;;  %v415_v40 = vpack.c.bf16 %v223_v39, %v221_v38  ;;  %v417_v43 = vpack.c.bf16 %v228_v42, %v226_v41  ;;  %v225_v44 = vld [vmem:[#allocation7 + $0x1e0] sm:$0xff]  ;;  %v227_v45 = vld [vmem:[#allocation7 + $0x1f0] sm:$0xff]  ;;  %v78_v47 = vlaneseq }
  0x51   :  { %v419_v46 = vpack.c.bf16 %v227_v45, %v225_v44  ;;  %v76_v50 = vld [vmem:[%s602_s2] sm:$0x3] }
  0x52   :  { %v79_v48 = vshrl.u32 %v78_v47, 7  ;;  %v229_v60 = vld [vmem:[%s604_s4] sm:$0x3] }
  0x53   :  { %380 = vmatpush1.bf16.msra.mxu1 %v379_v52  ;;  %v314_v63 = vld [vmem:[%s605_s5] sm:$0x3] }
  0x54   :  { %382 = vmatprep.subr.bf16.mxu1 %v381_v53  ;;  %v80_v49 = vsub.s32 0, %v79_v48  ;;  %v84_v51 = vsub.s32 1, %v79_v48  ;;  %v348_v11 = vld [vmem:[#allocation2] ss:$0 sm:$0xff] }
  0x56   :  { %v81_v52 = vrot.slane %v76_v50, %v80_v49  ;;  %v85_v53 = vrot.slane %v76_v50, %v84_v51  ;;  %v234_v61 = vrot.slane %v229_v60, %v80_v49  ;;  %v238_v62 = vrot.slane %v229_v60, %v84_v51 }
  0x57   :  { %384 = vmatpush1.bf16.msra.mxu1 %v383_v58  ;;  %v319_v3 = vrot.slane %v314_v63, %v80_v49  ;;  %v323_v5 = vrot.slane %v314_v63, %v84_v51 }
  0x58   :  { %386 = vmatprep.subr.bf16.mxu1 %v385_v59 }
  0x5b   :  { %388 = vmatpush1.bf16.msra.mxu1 %v387_v0 }
  0x5c   :  { %390 = vmatprep.subr.bf16.mxu1 %v389_v1 }
  0x5f   :  { %392 = vmatpush1.bf16.msra.mxu1 %v391_v6 }
  0x60   :  { %394 = vmatprep.subr.bf16.mxu1 %v393_v7 }
  0x63   :  { %396 = vmatpush1.bf16.msra.mxu1 %v395_v12 }
  0x64   :  { %398 = vmatprep.subr.bf16.mxu1 %v397_v13 }
  0x67   :  { %400 = vmatpush1.bf16.msra.mxu1 %v399_v18 }
  0x68   :  { %402 = vmatprep.subr.bf16.mxu1 %v401_v19 }
  0x6b   :  { %404 = vmatpush1.bf16.msra.mxu1 %v403_v24 }
  0x6c   :  { %406 = vmatprep.subr.bf16.mxu1 %v405_v25 }
  0x6f   :  { %408 = vmatpush1.bf16.msra.mxu1 %v407_v30 }
  0x70   :  { %410 = vmatprep.subr.bf16.mxu1 %v409_v31 }
  0x73   :  { %412 = vmatpush1.bf16.msra.mxu1 %v411_v36 }
  0x74   :  { %414 = vmatprep.subr.bf16.mxu1 %v413_v37 }
  0x77   :  { %416 = vmatpush1.bf16.msra.mxu1 %v415_v40 }
  0x78   :  { %418 = vmatprep.subr.bf16.mxu1 %v417_v43 }
  0x7b   :  { %420 = vmatpush1.bf16.msra.mxu1 %v419_v46 }
 0x116   :  { %v158_v54 = vpop.f32.mrb[0].mxu0 }
 0x117   :  { %v159_v55 = vadd.f32 %v158_v54, %v81_v52  ;;  %v160_v56 = vpop.f32.mrb[1].mxu0 }
 0x118   :  { %v161_v57 = vadd.f32 %v160_v56, %v85_v53 }
 0x119   :  { %v163_v59 = vmax.f32 %v159_v55, 0.0 }
 0x11a   :  { %v164_v58 = vmax.f32 %v161_v57, 0.0 }
 0x11c   :  { %305 = vmatprep.mubr.f32.mxu1 %v164_v58 }
 0x11d   :  { %306 = vmatmul.mubr.f32.vlgmr.msra.gmra.mrb[0].mxu1 %v163_v59 }
 0x1f0   :  { %v307_v0 = vpop.f32.mrb[0].mxu1 }
 0x1f1   :  { %v308_v1 = vadd.f32 %v307_v0, %v234_v61  ;;  %v309_v2 = vpop.f32.mrb[1].mxu1 }
 0x1f2   :  { %v310_v4 = vadd.f32 %v309_v2, %v238_v62 }
 0x1f3   :  { %v312_v6 = vmax.f32 %v308_v1, 0.0 }
 0x1f4   :  { %v313_v7 = vmax.f32 %v310_v4, 0.0 }
 0x1f5   :  { %v326_v8 = vmul.f32 %v319_v3, %v312_v6 }
 0x1f6   :  { %v327_v9 = vmul.f32 %v323_v5, %v313_v7 }
 0x1f8   :  { %v328_v10 = vadd.f32 %v327_v9, %v326_v8 }
 0x1fa   :  { %329 = vadd.xlane.f32.xlu0 %v328_v10 }
 0x287   :  { %v330_v12 = vpop.xlane.xlu0 %329 }
 0x288   :  { %v338_v13 = vadd.f32 %v348_v11, %v330_v12 }
 0x28a   :  { %340 = vst.msk [vmem:[%s607_s7] sm:$0xff] %vm339_vm1, %v338_v13 }
 0x28b   :  { %345 = vsyncpa [#allocation4], 1 }
 0x28c   :  { %346 = vsyncpa [#allocation6], 1 }

</bundles_post_ra>
